<compile_context>
chip_gen: v6e
topology: v6e:2x2x1
jax: 0.10.0
libtpu: 0.0.40
codegen_flags: <defaults>
</compile_context>

<pallas_src>
import jax
import jax.numpy as jnp
from jax.experimental import pallas as pl
from jax.experimental.pallas import tpu as pltpu


def _round_up(v, m):
    return (v + m - 1) // m * m


def _residual_dense_kernel(x_ref, w_ref, b_ref, o_ref):
    # x_ref: (TM, Dp) f32   w_ref: (Dp, Dp) bf16   b_ref: (1, Dp) f32
    x = x_ref[...]
    # bf16 operands feed the MXU at full rate on v5e/v6e/v7x; accumulate f32.
    y = jnp.dot(x.astype(jnp.bfloat16), w_ref[...],
                preferred_element_type=jnp.float32)
    # Residual semantics: fn(x) + x  (bias + residual add kept in f32).
    o_ref[...] = (y + b_ref[...] + x).astype(o_ref.dtype)


def residual_dense(x, w, b, *, tm=512):
    """out = (x @ w + b) + x, fused in a single Pallas kernel.

    x: (B, N, D) float32
    w: (D, D)    float32
    b: (D,)      float32
    """
    B, N, D = x.shape
    T = B * N

    # Lane-dense hidden dim (multiple of 128) and 8-aligned token tiles.
    Dp = _round_up(D, 128)
    tm_eff = min(tm, _round_up(T, 8))
    Tp = _round_up(T, tm_eff)

    x2 = jnp.pad(x.reshape(T, D), ((0, Tp - T), (0, Dp - D)))
    w_p = jnp.pad(w, ((0, Dp - D), (0, Dp - D))).astype(jnp.bfloat16)
    b_p = jnp.pad(b, (0, Dp - D)).reshape(1, Dp).astype(jnp.float32)

    grid = (Tp // tm_eff,)

    # VMEM budget: double-buffered x/out tiles (f32) + resident W (bf16,
    # double-buffer slot reserved anyway) + bias, with headroom.
    vmem_bytes = (2 * 2 * tm_eff * Dp * 4) + (2 * Dp * Dp * 2) + (2 * Dp * 4)
    vmem_limit = min(int(vmem_bytes * 1.5) + (4 << 20), 100 << 20)

    cost = pl.CostEstimate(
        flops=2 * Tp * Dp * Dp,
        transcendentals=0,
        bytes_accessed=4 * Tp * Dp * 2 + 2 * Dp * Dp + 4 * Dp,
    )

    out2 = pl.pallas_call(
        _residual_dense_kernel,
        out_shape=jax.ShapeDtypeStruct((Tp, Dp), x.dtype),
        grid_spec=pltpu.PrefetchScalarGridSpec(
            num_scalar_prefetch=0,
            grid=grid,
            in_specs=[
                pl.BlockSpec((tm_eff, Dp), lambda i: (i, 0)),  # x tile
                pl.BlockSpec((Dp, Dp), lambda i: (0, 0)),      # W (resident)
                pl.BlockSpec((1, Dp), lambda i: (0, 0)),       # b (resident)
            ],
            out_specs=pl.BlockSpec((tm_eff, Dp), lambda i: (i, 0)),
        ),
        compiler_params=pltpu.CompilerParams(
            dimension_semantics=("parallel",),
            vmem_limit_bytes=vmem_limit,
        ),
        cost_estimate=cost,
    )(x2, w_p, b_p)

    return out2[:T, :D].reshape(B, N, D)


if __name__ == "__main__":
    # Small transformer-token shapes implied by ViViT's Residual usage.
    B, N, D = 2, 8, 32
    key = jax.random.PRNGKey(0)
    kx, kw, kb = jax.random.split(key, 3)

    x = jax.random.normal(kx, (B, N, D), dtype=jnp.float32)
    # Deterministic synthetic parameters for fn (a dense projection).
    w = jax.random.normal(kw, (D, D), dtype=jnp.float32) * 0.02
    b = jax.random.normal(kb, (D,), dtype=jnp.float32) * 0.01

    fn = jax.jit(residual_dense)
    out = fn(x, w, b)
    jax.block_until_ready(out)

    # Reference: fn(x) + x in plain JAX (f32). Tolerance loosened because the
    # kernel's matmul runs the MXU with bf16 operands (f32 accumulation).
    ref = jnp.einsum("bnd,de->bne", x, w) + b + x
    assert out.shape == x.shape
    assert jnp.allclose(out, ref, atol=1e-2, rtol=1e-2)

    print("KERNEL_OK")
</pallas_src>

<mosaic_0001>
module attributes {stable_mosaic.version = 11 : i64} {
  func.func @_residual_dense_kernel(%arg0: i32, %arg1: memref<16x128xf32, #tpu.memory_space<vmem>>, %arg2: memref<128x128xbf16, #tpu.memory_space<vmem>>, %arg3: memref<1x128xf32, #tpu.memory_space<vmem>>, %arg4: memref<16x128xf32, #tpu.memory_space<vmem>>) attributes {dimension_semantics = [#tpu.dimension_semantics<parallel>], iteration_bounds = array<i64: 1>, scalar_prefetch = 0 : i64, scratch_operands = 0 : i64, tpu.core_type = #tpu.core_type<tc>, window_params = [{transform_indices = @transform_0, window_bounds = array<i64: 16, 128>}, {pipeline_mode = #tpu.pipeline_mode<synchronous>, transform_indices = @transform_1, window_bounds = array<i64: 128, 128>}, {pipeline_mode = #tpu.pipeline_mode<synchronous>, transform_indices = @transform_2, window_bounds = array<i64: 1, 128>}, {transform_indices = @transform_3, window_bounds = array<i64: 16, 128>}]} {
    %c0 = arith.constant 0 : index
    %c0_0 = arith.constant 0 : index
    %0 = vector.load %arg1[%c0, %c0_0] : memref<16x128xf32, #tpu.memory_space<vmem>>, vector<16x128xf32>
    %1 = arith.truncf %0 : vector<16x128xf32> to vector<16x128xbf16>
    %c0_1 = arith.constant 0 : index
    %c0_2 = arith.constant 0 : index
    %2 = vector.load %arg2[%c0_1, %c0_2] : memref<128x128xbf16, #tpu.memory_space<vmem>>, vector<128x128xbf16>
    %cst = arith.constant dense<0.000000e+00> : vector<16x128xf32>
    %3 = tpu.matmul %1, %2, %cst {dimension_numbers = #tpu.dot_dimension_numbers<[1], [0], [0], [1], [0, 0, 1, 1], [], []>} : vector<16x128xbf16>, vector<128x128xbf16>, vector<16x128xf32> -> vector<16x128xf32>
    %c0_3 = arith.constant 0 : index
    %c0_4 = arith.constant 0 : index
    %4 = vector.load %arg3[%c0_3, %c0_4] : memref<1x128xf32, #tpu.memory_space<vmem>>, vector<1x128xf32>
    %5 = vector.broadcast %4 : vector<1x128xf32> to vector<16x128xf32>
    %6 = arith.addf %3, %5 : vector<16x128xf32>
    %7 = arith.addf %6, %0 : vector<16x128xf32>
    %c0_5 = arith.constant 0 : index
    %c0_6 = arith.constant 0 : index
    %8 = vector.load %arg4[%c0_5, %c0_6] : memref<16x128xf32, #tpu.memory_space<vmem>>, vector<16x128xf32>
    tpu.vector_store %arg4[%c0_5, %c0_6], %7 {strides = array<i32>} : memref<16x128xf32, #tpu.memory_space<vmem>>, vector<16x128xf32>,
    return
  }
  func.func @transform_0(%arg0: i32) -> (i32, i32) {
    %c0_i32 = arith.constant 0 : i32
    %c0_i32_0 = arith.constant 0 : i32
    return %arg0, %c0_i32 : i32, i32
  }
  func.func @transform_1(%arg0: i32) -> (i32, i32) {
    %c0_i32 = arith.constant 0 : i32
    %c0_i32_0 = arith.constant 0 : i32
    %c0_i32_1 = arith.constant 0 : i32
    return %c0_i32, %c0_i32_0 : i32, i32
  }
  func.func @transform_2(%arg0: i32) -> (i32, i32) {
    %c0_i32 = arith.constant 0 : i32
    %c0_i32_0 = arith.constant 0 : i32
    %c0_i32_1 = arith.constant 0 : i32
    return %c0_i32, %c0_i32_0 : i32, i32
  }
  func.func @transform_3(%arg0: i32) -> (i32, i32) {
    %c0_i32 = arith.constant 0 : i32
    %c0_i32_0 = arith.constant 0 : i32
    return %arg0, %c0_i32 : i32, i32
  }
}

</mosaic_0001>

<bundles_post_ra>
// kernel: residual_dense.1
= control target key start
LH: loop header
LB: loop body
LE: loop exit
PB: predicated region body
PF: predicated region fallthrough
CT: control target
= control target key end

     0   :  { %v186_v0 = vmov 0.0   ;;  %vm187_vm0 = vmmov 0   ;;  %s247_s1 = inlined_call_operand.vmem [shape: bf16[128,128], index: 1, kind: input, shape index: {}]   ;;  %s248_s0 = inlined_call_operand.vmem [shape: f32[16,128], index: 0, kind: input, shape index: {}]   ;;  %s249_s2 = inlined_call_operand.vmem [shape: f32[1,128], index: 2, kind: input, shape index: {}]   ;;  %s250_s3 = inlined_call_operand.vmem [shape: f32[16,128], index: 3, kind: output, shape index: {}]  }
   0x1   :  { %156 = vmatprep.subr.bf16.mxu0 %v186_v0  ;;  %v178_v1 = vld [vmem:[%s247_s1 + $0x38] sm:$0xff]   ;;  %172 = vmatprep.mubr.msk.bf16.mxu0 %vm187_vm0, %v186_v0  ;;  %v179_v2 = vld [vmem:[%s247_s1 + $0x30] sm:$0xff]   ;;  %v180_v3 = vld [vmem:[%s247_s1 + $0x28] sm:$0xff]  }
   0x2   :  { %157 = vmatpush3.bf16.msra.mxu0 %v178_v1  ;;  %v181_v4 = vld [vmem:[%s247_s1 + $0x20] sm:$0xff]   ;;  %v182_v5 = vld [vmem:[%s247_s1 + $0x18] sm:$0xff]   ;;  %v183_v6 = vld [vmem:[%s247_s1 + $0x10] sm:$0xff]  }
   0x3   :  { %158 = vmatprep.subr.bf16.mxu0 %v186_v0  ;;  %v184_v7 = vld [vmem:[%s247_s1 + $0x8] sm:$0xff]   ;;  %v185_v8 = vld [vmem:[%s247_s1] sm:$0xff]  }
   0x4   :  { %v15_v9 = vld [vmem:[%s248_s0] sm:$0xff]  ;;  %v16_v10 = vld [vmem:[%s248_s0 + $0x8] sm:$0xff] }
   0x5   :  { %v17_v11 = vpack.c.bf16 %v16_v10, %v15_v9  ;;  %v138_v12 = vld [vmem:[%s249_s2] ss:$0 sm:$0xff] }
   0x6   :  { %159 = vmatpush3.bf16.msra.mxu0 %v179_v2 }
   0x7   :  { %160 = vmatprep.subr.bf16.mxu0 %v186_v0 }
   0xa   :  { %161 = vmatpush3.bf16.msra.mxu0 %v180_v3 }
   0xb   :  { %162 = vmatprep.subr.bf16.mxu0 %v186_v0 }
   0xe   :  { %163 = vmatpush3.bf16.msra.mxu0 %v181_v4 }
   0xf   :  { %164 = vmatprep.subr.bf16.mxu0 %v186_v0 }
  0x12   :  { %165 = vmatpush3.bf16.msra.mxu0 %v182_v5 }
  0x13   :  { %166 = vmatprep.subr.bf16.mxu0 %v186_v0 }
  0x16   :  { %167 = vmatpush3.bf16.msra.mxu0 %v183_v6 }
  0x17   :  { %168 = vmatprep.subr.bf16.mxu0 %v186_v0 }
  0x1a   :  { %169 = vmatpush3.bf16.msra.mxu0 %v184_v7 }
  0x1b   :  { %170 = vmatprep.subr.bf16.mxu0 %v186_v0 }
  0x1e   :  { %171 = vmatpush3.bf16.msra.mxu0 %v185_v8 }
  0x21   :  { %173 = vmatmul.mubr.bf16.vlgmr.msra.gmra.mxu0 %v17_v11 }
  0xe1   :  { %v123_v13 = vpop.f32.mrf.mxu0 }
  0xe2   :  { %v124_v14 = vadd.f32 %v138_v12, %v123_v13 }
  0xe3   :  { %v174_v15 = vpop.f32.mrf.mxu0 }
  0xe4   :  { %v130_v16 = vadd.f32 %v124_v14, %v15_v9 }
  0xe5   :  { %v126_v17 = vpop.f32.mrf.mxu0 }
  0xe6   :  { %132 = vst [vmem:[%s250_s3] sm:$0xff] %v130_v16  ;;  %v127_v18 = vadd.f32 %v138_v12, %v126_v17 }
  0xe7   :  { %v175_v19 = vpop.f32.mrf.mxu0 }
  0xe8   :  { %v131_v20 = vadd.f32 %v127_v18, %v16_v10 }
  0xea   :  { %133 = vst [vmem:[%s250_s3 + $0x8] sm:$0xff] %v131_v20 }

</bundles_post_ra>
